<compile_context>
chip_gen: v7x
topology: tpu7x:2x2x1
jax: 0.10.0
libtpu: 0.0.40
codegen_flags: <defaults>
</compile_context>

<pallas_src>
import numpy as np
import jax
import jax.numpy as jnp
from jax.experimental import pallas as pl
from jax.experimental.pallas import tpu as pltpu

LANE = 128
K_SEL = 4                      # MixedOp.k : top C//4 channels are processed
N_OPS = 6                      # number of NAS primitives (hard-coded 6 in source)
KSIZES = (1, 3, 5, 1, 3, 5)    # assumed primitive kernel sizes (see TODO above)
KMAX = max(KSIZES)


def _round_up(x, m):
    return ((x + m - 1) // m) * m


# ------------------------------ Pallas kernel ------------------------------ #
def _bmm_kernel(p_ref, w_ref, o_ref):
    """One MXU matmul per (batch, row-tile): out = patches @ folded_weights."""
    o_ref[...] = jnp.dot(p_ref[...], w_ref[...],
                         preferred_element_type=jnp.float32).astype(o_ref.dtype)


def _batched_patch_matmul(P, Wf, compute_dtype):
    """P: [N, M, K] im2col patches, Wf: [N, K, C] per-batch folded conv weights.
    Returns [N, M, C] in f32 (f32 MXU accumulation regardless of compute_dtype)."""
    N, M, K = P.shape
    C = Wf.shape[-1]
    K_pad = _round_up(K, LANE)
    C_pad = _round_up(C, LANE)
    TM = min(512, _round_up(M, 8))
    M_pad = _round_up(M, TM)
    itemsize = np.dtype(compute_dtype).itemsize

    Pp = jnp.pad(P, ((0, 0), (0, M_pad - M), (0, K_pad - K))).astype(compute_dtype)
    Wp = jnp.pad(Wf, ((0, 0), (0, K_pad - K), (0, C_pad - C))).astype(compute_dtype)

    cost = pl.CostEstimate(
        flops=2 * N * M_pad * K_pad * C_pad,
        transcendentals=0,
        bytes_accessed=N * (M_pad * K_pad + K_pad * C_pad) * itemsize
        + N * M_pad * C_pad * 4)

    out = pl.pallas_call(
        _bmm_kernel,
        out_shape=jax.ShapeDtypeStruct((N, M_pad, C_pad), jnp.float32),
        grid=(N, M_pad // TM),
        in_specs=[pl.BlockSpec((None, TM, K_pad), lambda n, m: (n, m, 0)),
                  pl.BlockSpec((None, K_pad, C_pad), lambda n, m: (n, 0, 0))],
        out_specs=pl.BlockSpec((None, TM, C_pad), lambda n, m: (n, m, 0)),
        compiler_params=pltpu.CompilerParams(
            dimension_semantics=("parallel", "parallel")),
        cost_estimate=cost,
    )(Pp, Wp)
    return out[:, :M, :C]


# ------------------------------ small helpers ------------------------------ #
def _relu(x):
    return jnp.maximum(x, 0.0)


def _channel_attention_gate(x_nchw, w1, w2):
    """ChannelAttention: sigmoid(MLP(avgpool) + MLP(maxpool)). w1:[C//2,C] w2:[C,C//2]."""
    avg = jnp.mean(x_nchw, axis=(2, 3))
    mx = jnp.max(x_nchw, axis=(2, 3))

    def mlp(v):
        return jnp.maximum(v @ w1.T, 0.0) @ w2.T

    return jax.nn.sigmoid(mlp(avg) + mlp(mx))                      # [N, C]


def _attention_module_gate(pooled, w1, w2):
    """AttentionModule fc: sigmoid(W2 relu(W1 pooled)). w1:[ch//8,ch] w2:[ch,ch//8]."""
    return jax.nn.sigmoid(jnp.maximum(pooled @ w1.T, 0.0) @ w2.T)  # [N, ch]


def _im2col(x_nhwc, k, stride=1):
    """[N,H,W,C] -> ([N, Ho*Wo, k*k*C], (Ho,Wo)) with 'same' padding (pad=k//2)."""
    N, H, W, C = x_nhwc.shape
    pad = k // 2
    xp = jnp.pad(x_nhwc, ((0, 0), (pad, pad), (pad, pad), (0, 0)))
    Ho = (H + 2 * pad - k) // stride + 1
    Wo = (W + 2 * pad - k) // stride + 1
    cols = []
    for di in range(k):
        for dj in range(k):
            cols.append(xp[:, di:di + stride * Ho:stride,
                           dj:dj + stride * Wo:stride, :])
    patches = jnp.stack(cols, axis=3)                              # [N,Ho,Wo,k*k,C]
    return patches.reshape(N, Ho * Wo, k * k * C), (Ho, Wo)


def _combined_op_weight(op_weights, kmax):
    """Zero-pad every primitive kernel to kmax x kmax (valid: all use 'same' padding
    and the same stride) and lay them out as one (kmax*kmax*Cin, N_OPS*Cout) matmul
    weight whose column blocks follow the torch.cat(temp, dim=1) channel order."""
    cols = []
    for wk in op_weights:
        cout, cin, k, _ = wk.shape
        off = (kmax - k) // 2
        wpad = jnp.zeros((cout, cin, kmax, kmax), wk.dtype)
        wpad = wpad.at[:, :, off:off + k, off:off + k].set(wk)
        cols.append(jnp.transpose(wpad, (2, 3, 1, 0)).reshape(kmax * kmax * cin, cout))
    return jnp.concatenate(cols, axis=1)


def _mixed_op_select(x, params):
    """ChannelAttention scaling + top-(C//4) channel selection (shared by both paths)."""
    C = x.shape[1]
    gate = _channel_attention_gate(x, params["ca_w1"], params["ca_w2"])
    x = x * gate[:, :, None, None]
    slist = jnp.sum(gate, axis=0)                                  # sum over batch
    _, idx = jax.lax.top_k(slist, C // K_SEL)                      # largest, sorted
    xtemp = jnp.take(x, idx, axis=1)
    return x, idx, xtemp


# --------------------------------- MixedOp --------------------------------- #
def mixed_op_pallas(x, params, compute_dtype=jnp.float32):
    """MixedOp forward (Pallas path).  x: [N, C, H, W], already activated."""
    N, C, H, W = x.shape
    cs = C // K_SEL
    x, idx, xtemp = _mixed_op_select(x, params)

    # im2col patches for the single fused KMAX x KMAX conv over all 6 branches.
    P, (Ho, Wo) = _im2col(jnp.transpose(xtemp, (0, 2, 3, 1)), KMAX, stride=1)
    Wcomb = _combined_op_weight(params["op_weights"], KMAX)        # [K, 6*cs]
    K = Wcomb.shape[0]

    # AttentionModule gate from *pooled* branch outputs (exact by linearity:
    # mean_hw(temp) == mean_rows(P) @ Wcomb), so temp is never materialized.
    pooled_temp = jnp.mean(P, axis=1) @ Wcomb                      # [N, 6*cs]
    y = _attention_module_gate(pooled_temp, params["att_w1"], params["att_w2"])
    # TODO(synk): op_attention (sum - std per chunk of y) is discarded by
    # Cell_dis_Auto.residual, so it is not computed here.

    # Fold the per-(batch, out-channel) gate into the conv weights:
    #   out = sum_i y_i * conv_i(xt)  ==  P @ (sum_i y_i * Wcomb_i)
    Wf = jnp.einsum("koc,noc->nkc",
                    Wcomb.reshape(K, N_OPS, cs), y.reshape(N, N_OPS, cs))

    out = _batched_patch_matmul(P, Wf, compute_dtype)              # [N, Ho*Wo, cs]
    out = jnp.transpose(out.reshape(N, Ho, Wo, cs), (0, 3, 1, 2))  # NCHW
    return x.at[:, idx, :, :].set(out.astype(x.dtype))


def mixed_op_reference(x, params):
    """Pure-JAX reference MixedOp: per-branch lax.conv + explicit temp/attention."""
    N, C, H, W = x.shape
    cs = C // K_SEL
    x, idx, xtemp = _mixed_op_select(x, params)
    outs = []
    for wk in params["op_weights"]:
        k = wk.shape[-1]
        outs.append(jax.lax.conv_general_dilated(
            xtemp, wk, (1, 1), [(k // 2, k // 2)] * 2,
            dimension_numbers=("NCHW", "OIHW", "NCHW")))
    temp = jnp.concatenate(outs, axis=1)                           # [N, 6*cs, H, W]
    pooled = jnp.mean(temp, axis=(2, 3))
    y = _attention_module_gate(pooled, params["att_w1"], params["att_w2"])
    att = temp * y[:, :, None, None]
    out = sum(att[:, i * cs:(i + 1) * cs] for i in range(N_OPS))
    return x.at[:, idx, :, :].set(out)


# ------------------------------ Cell_dis_Auto ------------------------------ #
def cell_dis_auto_forward(x, arch_weights, params, mixed_op_fn):
    """Cell_dis_Auto.forward: residual(x, weights) + shortcut(x)."""
    h = _relu(x)
    # TODO(synk): use_gumbel=False; the softmaxed architecture weights are computed
    # to mirror residual(), but the source MixedOp.forward never consumes them.
    _a0 = jax.nn.softmax(arch_weights[0], axis=-1)
    h = mixed_op_fn(h, params["c1"])
    h = _relu(h)
    _a1 = jax.nn.softmax(arch_weights[1], axis=-1)
    h = mixed_op_fn(h, params["c2"])
    # downsample=False and in_channels == out_channels -> shortcut is identity.
    # TODO(synk): learnable 1x1 shortcut conv (+ spectral norm) not needed here.
    return h + x


def _init_mixed_op_params(key, C):
    cs = C // K_SEL
    ch_att = cs * N_OPS                   # AttentionModule channel = C*6//k
    hid = ch_att // 8                     # ratio = 8
    ks = jax.random.split(key, 4 + N_OPS)

    def norm(k, shape, fan_in):
        return jax.random.normal(k, shape, jnp.float32) / np.sqrt(fan_in)

    return {
        "ca_w1": norm(ks[0], (C // 2, C), C),
        "ca_w2": norm(ks[1], (C, C // 2), C // 2),
        "att_w1": norm(ks[2], (hid, ch_att), ch_att),
        "att_w2": norm(ks[3], (ch_att, hid), hid),
        "op_weights": tuple(
            norm(ks[4 + i], (cs, cs, k, k), cs * k * k)
            for i, k in enumerate(KSIZES)),
    }


if __name__ == "__main__":
    key = jax.random.PRNGKey(0)
    N, C, H, W = 2, 16, 16, 16            # in_channels == out_channels == 16

    k_x, k_w, k_c1, k_c2 = jax.random.split(key, 4)
    x = jax.random.normal(k_x, (N, C, H, W), jnp.float32)
    arch_weights = jax.random.normal(k_w, (2, N_OPS), jnp.float32)
    params = {"c1": _init_mixed_op_params(k_c1, C),
              "c2": _init_mixed_op_params(k_c2, C)}

    # Pure-JAX reference (per-branch lax.conv, explicit temp/attention path).
    ref = jax.block_until_ready(
        cell_dis_auto_forward(x, arch_weights, params, mixed_op_reference))

    # Pallas path, f32 matmul (branch/attention weight fold is exact algebra).
    pallas_f32 = jax.jit(lambda xx, ww, pp: cell_dis_auto_forward(
        xx, ww, pp, lambda h, p: mixed_op_pallas(h, p, jnp.float32)))
    out = jax.block_until_ready(pallas_f32(x, arch_weights, params))
    assert out.shape == ref.shape == (N, C, H, W)
    np.testing.assert_allclose(np.asarray(out), np.asarray(ref),
                               rtol=1e-3, atol=1e-3)

    # bf16 matmul fast path (f32 accumulation) — smoke test only, since a bf16
    # perturbation can legitimately flip the data-dependent top-k selection.
    pallas_bf16 = jax.jit(lambda xx, ww, pp: cell_dis_auto_forward(
        xx, ww, pp, lambda h, p: mixed_op_pallas(h, p, jnp.bfloat16)))
    out_bf16 = jax.block_until_ready(pallas_bf16(x, arch_weights, params))
    assert out_bf16.shape == ref.shape
    assert bool(jnp.all(jnp.isfinite(out_bf16)))

    print("KERNEL_OK")
</pallas_src>

<mosaic_0001>
module attributes {stable_mosaic.version = 11 : i64} {
  func.func @_bmm_kernel(%arg0: i32, %arg1: i32, %arg2: memref<1x256x128xf32, #tpu.memory_space<vmem>>, %arg3: memref<1x128x128xf32, #tpu.memory_space<vmem>>, %arg4: memref<1x256x128xf32, #tpu.memory_space<vmem>>) attributes {dimension_semantics = [#tpu.dimension_semantics<parallel>, #tpu.dimension_semantics<parallel>], iteration_bounds = array<i64: 2, 1>, scalar_prefetch = 0 : i64, scratch_operands = 0 : i64, tpu.core_type = #tpu.core_type<tc>, window_params = [{transform_indices = @transform_0, window_bounds = array<i64: 1, 256, 128>}, {transform_indices = @transform_1, window_bounds = array<i64: 1, 128, 128>}, {transform_indices = @transform_2, window_bounds = array<i64: 1, 256, 128>}]} {
    %c0 = arith.constant 0 : index
    %c0_0 = arith.constant 0 : index
    %c0_1 = arith.constant 0 : index
    %0 = vector.load %arg2[%c0, %c0_0, %c0_1] : memref<1x256x128xf32, #tpu.memory_space<vmem>>, vector<1x256x128xf32>
    %1 = vector.shape_cast %0 : vector<1x256x128xf32> to vector<256x128xf32>
    %c0_2 = arith.constant 0 : index
    %c0_3 = arith.constant 0 : index
    %c0_4 = arith.constant 0 : index
    %2 = vector.load %arg3[%c0_2, %c0_3, %c0_4] : memref<1x128x128xf32, #tpu.memory_space<vmem>>, vector<1x128x128xf32>
    %3 = vector.shape_cast %2 : vector<1x128x128xf32> to vector<128x128xf32>
    %cst = arith.constant dense<0.000000e+00> : vector<256x128xf32>
    %4 = tpu.matmul %1, %3, %cst {dimension_numbers = #tpu.dot_dimension_numbers<[1], [0], [0], [1], [0, 0, 1, 1], [], []>} : vector<256x128xf32>, vector<128x128xf32>, vector<256x128xf32> -> vector<256x128xf32>
    %c0_5 = arith.constant 0 : index
    %c0_6 = arith.constant 0 : index
    %c0_7 = arith.constant 0 : index
    %5 = vector.load %arg4[%c0_5, %c0_6, %c0_7] : memref<1x256x128xf32, #tpu.memory_space<vmem>>, vector<1x256x128xf32>
    %6 = vector.shape_cast %5 : vector<1x256x128xf32> to vector<256x128xf32>
    %7 = vector.shape_cast %4 : vector<256x128xf32> to vector<1x256x128xf32>
    tpu.vector_store %arg4[%c0_5, %c0_6, %c0_7], %7 {strides = array<i32>} : memref<1x256x128xf32, #tpu.memory_space<vmem>>, vector<1x256x128xf32>,
    return
  }
  func.func @transform_0(%arg0: i32, %arg1: i32) -> (i32, i32, i32) {
    %c0_i32 = arith.constant 0 : i32
    %c0_i32_0 = arith.constant 0 : i32
    return %arg0, %arg1, %c0_i32 : i32, i32, i32
  }
  func.func @transform_1(%arg0: i32, %arg1: i32) -> (i32, i32, i32) {
    %c0_i32 = arith.constant 0 : i32
    %c0_i32_0 = arith.constant 0 : i32
    %c0_i32_1 = arith.constant 0 : i32
    return %arg0, %c0_i32, %c0_i32_0 : i32, i32, i32
  }
  func.func @transform_2(%arg0: i32, %arg1: i32) -> (i32, i32, i32) {
    %c0_i32 = arith.constant 0 : i32
    %c0_i32_0 = arith.constant 0 : i32
    return %arg0, %arg1, %c0_i32 : i32, i32, i32
  }
}

</mosaic_0001>

<bundles_post_ra>
// kernel: _lambda_.2
= control target key start
LH: loop header
LB: loop body
LE: loop exit
PB: predicated region body
PF: predicated region fallthrough
CT: control target
= control target key end

     0   :  { %s862_s9 = smov 0   ;;  %s864_s10 = smov 0   ;;  %s992_s0 = inlined_call_operand.vmem [shape: f32[2,256,128], index: 0, kind: input, shape index: {}]   ;;  %s993_s1 = inlined_call_operand.vmem [shape: f32[2,128,128], index: 1, kind: input, shape index: {}]   ;;  %s994_s2 = inlined_call_operand.vmem [shape: f32[2,256,128], index: 2, kind: output, shape index: {}]  }
   0x1   :  { %s866_s11 = smov 0  }
   0x2 LB: > { %s24_s12 = sadd.s32 1, %s841_s10  ;;  %p611_p0 = scmp.ge.s32.totalorder %s845_s11, 1  ;;  %s845_s11 = sphi %s866_s11, %s12_s11   ;;  %s841_s10 = sphi %s864_s10, %s996_s10   ;;  %s837_s9 = sphi %s862_s9, %s995_s9  }
   0x3   : > { %p26_p1 = scmp.ge.s32.totalorder %s24_s12, 2  ;;  %p143_p2 = scmp.lt.s32.totalorder %s845_s11, 3 }
   0x5   : > { %s998_s12 = smov (%p26_p1, %s24_s12), 0  ;;  %p144_p3 = pnand %p611_p0, %p143_p2 }
   0x6   : > { %p179_p4 = scmp.lt.s32.totalorder (!%p144_p3), %s837_s9, 1 }
   0x7   : > { %147 = sbr.rel (%p144_p3) target bundleno = 294 (0x126), region = 28 }
   0xe   : > { %s1000_s9 = smov (!%p179_p4, %s837_s9), 1 }
   0xf   : > { %s621_s13 = sshll.u32 %s1000_s9, 7  ;;  %s620_s14 = sshll.u32 %s1000_s9, 8 }
  0x10   : > { %s887_s17 = scalar_lea.vmem %s993_s1, %s621_s13  ;;  %s898_s20 = scalar_lea.vmem %s992_s0, %s620_s14 }
  0x11   : > { %v235_v0 = vld [vmem:[%s887_s17] sm:$0xff]  ;;  %v236_v1 = vld [vmem:[%s887_s17 + $0x8] sm:$0xff]  ;;  %v237_v2 = vld [vmem:[%s887_s17 + $0x10] sm:$0xff]  ;;  %s949_s23 = scalar_lea.vmem %s994_s2, %s620_s14 }
  0x12   : > { %v751_v3 = vpack.c.bf16 %v236_v1, %v235_v0  ;;  %v238_v4 = vld [vmem:[%s887_s17 + $0x18] sm:$0xff]  ;;  %v239_v6 = vld [vmem:[%s887_s17 + $0x20] sm:$0xff]  ;;  %v240_v7 = vld [vmem:[%s887_s17 + $0x28] sm:$0xff] }
  0x13   : > { %v755_v5 = vpack.c.bf16 %v238_v4, %v237_v2  ;;  %v759_v8 = vpack.c.bf16 %v240_v7, %v239_v6  ;;  %v203_v9 = vld [vmem:[%s898_s20] sm:$0xff]  ;;  %v241_v11 = vld [vmem:[%s887_s17 + $0x30] sm:$0xff]  ;;  %v242_v12 = vld [vmem:[%s887_s17 + $0x38] sm:$0xff] }
  0x14   : > { %752 = vmatprep.subr.bf16.mxu0 %v751_v3  ;;  %783 = vmatprep.subr.bf16.mxu1 %v751_v3  ;;  %v219_v10 = vld [vmem:[%s898_s20 + $0x80] sm:$0xff]  ;;  %v763_v13 = vpack.c.bf16 %v242_v12, %v241_v11  ;;  %v244_v15 = vld [vmem:[%s887_s17 + $0x48] sm:$0xff]  ;;  %v245_v17 = vld [vmem:[%s887_s17 + $0x50] sm:$0xff] }
  0x15   : > { %754 = vmatpush3.bf16.msra.mxu0 %v751_v3  ;;  %791 = vmatpush3.bf16.msra.mxu1 %v751_v3  ;;  %v243_v14 = vld [vmem:[%s887_s17 + $0x40] sm:$0xff]  ;;  %v246_v18 = vld [vmem:[%s887_s17 + $0x58] sm:$0xff]  ;;  %v248_v21 = vld [vmem:[%s887_s17 + $0x68] sm:$0xff] }
  0x16   : > { %756 = vmatprep.subr.bf16.mxu0 %v755_v5  ;;  %784 = vmatprep.subr.bf16.mxu1 %v755_v5  ;;  %v767_v16 = vpack.c.bf16 %v244_v15, %v243_v14  ;;  %v771_v19 = vpack.c.bf16 %v246_v18, %v245_v17  ;;  %v247_v20 = vld [vmem:[%s887_s17 + $0x60] sm:$0xff]  ;;  %v249_v23 = vld [vmem:[%s887_s17 + $0x70] sm:$0xff]  ;;  %v250_v24 = vld [vmem:[%s887_s17 + $0x78] sm:$0xff] }
  0x17   : > { %703 = vmatprep.mubr.f32.mxu0 %v203_v9  ;;  %727 = vmatprep.mubr.f32.mxu1 %v219_v10  ;;  %v775_v22 = vpack.c.bf16 %v248_v21, %v247_v20  ;;  %v779_v25 = vpack.c.bf16 %v250_v24, %v249_v23  ;;  %v204_v26 = vld [vmem:[%s898_s20 + $0x8] sm:$0xff]  ;;  %v205_v28 = vld [vmem:[%s898_s20 + $0x10] sm:$0xff]  ;;  %v206_v30 = vld [vmem:[%s898_s20 + $0x18] sm:$0xff] }
  0x18   : > { %v220_v27 = vld [vmem:[%s898_s20 + $0x88] sm:$0xff]  ;;  %v221_v29 = vld [vmem:[%s898_s20 + $0x90] sm:$0xff]  ;;  %v222_v31 = vld [vmem:[%s898_s20 + $0x98] sm:$0xff] }
  0x19   : > { %758 = vmatpush3.bf16.msra.mxu0 %v755_v5  ;;  %792 = vmatpush3.bf16.msra.mxu1 %v755_v5  ;;  %v207_v32 = vld [vmem:[%s898_s20 + $0x20] sm:$0xff]  ;;  %v208_v34 = vld [vmem:[%s898_s20 + $0x28] sm:$0xff]  ;;  %v209_v36 = vld [vmem:[%s898_s20 + $0x30] sm:$0xff] }
  0x1a   : > { %760 = vmatprep.subr.bf16.mxu0 %v759_v8  ;;  %785 = vmatprep.subr.bf16.mxu1 %v759_v8  ;;  %v223_v33 = vld [vmem:[%s898_s20 + $0xa0] sm:$0xff]  ;;  %v224_v35 = vld [vmem:[%s898_s20 + $0xa8] sm:$0xff]  ;;  %v225_v37 = vld [vmem:[%s898_s20 + $0xb0] sm:$0xff] }
  0x1b   : > { %v210_v38 = vld [vmem:[%s898_s20 + $0x38] sm:$0xff]  ;;  %v211_v40 = vld [vmem:[%s898_s20 + $0x40] sm:$0xff]  ;;  %v212_v42 = vld [vmem:[%s898_s20 + $0x48] sm:$0xff] }
  0x1c   : > { %v226_v39 = vld [vmem:[%s898_s20 + $0xb8] sm:$0xff]  ;;  %v227_v41 = vld [vmem:[%s898_s20 + $0xc0] sm:$0xff]  ;;  %v228_v43 = vld [vmem:[%s898_s20 + $0xc8] sm:$0xff] }
  0x1d   : > { %762 = vmatpush3.bf16.msra.mxu0 %v759_v8  ;;  %793 = vmatpush3.bf16.msra.mxu1 %v759_v8  ;;  %v213_v44 = vld [vmem:[%s898_s20 + $0x50] sm:$0xff]  ;;  %v214_v46 = vld [vmem:[%s898_s20 + $0x58] sm:$0xff]  ;;  %v215_v48 = vld [vmem:[%s898_s20 + $0x60] sm:$0xff] }
  0x1e   : > { %764 = vmatprep.subr.bf16.mxu0 %v763_v13  ;;  %786 = vmatprep.subr.bf16.mxu1 %v763_v13  ;;  %v229_v45 = vld [vmem:[%s898_s20 + $0xd0] sm:$0xff]  ;;  %v230_v47 = vld [vmem:[%s898_s20 + $0xd8] sm:$0xff]  ;;  %v231_v49 = vld [vmem:[%s898_s20 + $0xe0] sm:$0xff] }
  0x1f   : > { %v216_v50 = vld [vmem:[%s898_s20 + $0x68] sm:$0xff]  ;;  %v217_v52 = vld [vmem:[%s898_s20 + $0x70] sm:$0xff]  ;;  %v218_v54 = vld [vmem:[%s898_s20 + $0x78] sm:$0xff] }
  0x20   : > { %v232_v51 = vld [vmem:[%s898_s20 + $0xe8] sm:$0xff]  ;;  %v233_v53 = vld [vmem:[%s898_s20 + $0xf0] sm:$0xff]  ;;  %v234_v55 = vld [vmem:[%s898_s20 + $0xf8] sm:$0xff] }
  0x21   : > { %766 = vmatpush3.bf16.msra.mxu0 %v763_v13  ;;  %794 = vmatpush3.bf16.msra.mxu1 %v763_v13 }
  0x22   : > { %768 = vmatprep.subr.bf16.mxu0 %v767_v16  ;;  %787 = vmatprep.subr.bf16.mxu1 %v767_v16 }
  0x25   : > { %770 = vmatpush3.bf16.msra.mxu0 %v767_v16  ;;  %795 = vmatpush3.bf16.msra.mxu1 %v767_v16 }
  0x26   : > { %772 = vmatprep.subr.bf16.mxu0 %v771_v19  ;;  %788 = vmatprep.subr.bf16.mxu1 %v771_v19 }
  0x29   : > { %774 = vmatpush3.bf16.msra.mxu0 %v771_v19  ;;  %796 = vmatpush3.bf16.msra.mxu1 %v771_v19 }
  0x2a   : > { %776 = vmatprep.subr.bf16.mxu0 %v775_v22  ;;  %789 = vmatprep.subr.bf16.mxu1 %v775_v22 }
  0x2d   : > { %778 = vmatpush3.bf16.msra.mxu0 %v775_v22  ;;  %797 = vmatpush3.bf16.msra.mxu1 %v775_v22 }
  0x2e   : > { %780 = vmatprep.subr.bf16.mxu0 %v779_v25  ;;  %790 = vmatprep.subr.bf16.mxu1 %v779_v25 }
  0x31   : > { %782 = vmatpush3.bf16.msra.mxu0 %v779_v25  ;;  %798 = vmatpush3.bf16.msra.mxu1 %v779_v25 }
  0x34   : > { %704 = vmatmul.mubr.f32.vlgmr.msra.gmra.mrb[0].mxu0 %v204_v26  ;;  %728 = vmatmul.mubr.f32.vlgmr.msra.gmra.mrb[0].mxu1 %v220_v27 }
  0x35   : > { %706 = vmatprep.mubr.f32.mxu0 %v205_v28  ;;  %730 = vmatprep.mubr.f32.mxu1 %v221_v29 }
  0x38   : > { %707 = vmatmul.mubr.f32.gmra.mrb[2].mxu0 %v206_v30  ;;  %731 = vmatmul.mubr.f32.gmra.mrb[2].mxu1 %v222_v31 }
  0x39   : > { %709 = vmatprep.mubr.f32.mxu0 %v207_v32  ;;  %733 = vmatprep.mubr.f32.mxu1 %v223_v33 }
  0x3c   : > { %710 = vmatmul.mubr.f32.gmra.mrb[4].mxu0 %v208_v34  ;;  %734 = vmatmul.mubr.f32.gmra.mrb[4].mxu1 %v224_v35 }
  0x3d   : > { %712 = vmatprep.mubr.f32.mxu0 %v209_v36  ;;  %736 = vmatprep.mubr.f32.mxu1 %v225_v37 }
  0x40   : > { %713 = vmatmul.mubr.f32.gmra.mrb[6].mxu0 %v210_v38  ;;  %737 = vmatmul.mubr.f32.gmra.mrb[6].mxu1 %v226_v39 }
  0x41   : > { %715 = vmatprep.mubr.f32.mxu0 %v211_v40  ;;  %739 = vmatprep.mubr.f32.mxu1 %v227_v41 }
  0x44   : > { %716 = vmatmul.mubr.f32.gmra.mrb[8].mxu0 %v212_v42  ;;  %740 = vmatmul.mubr.f32.gmra.mrb[8].mxu1 %v228_v43 }
  0x45   : > { %718 = vmatprep.mubr.f32.mxu0 %v213_v44  ;;  %742 = vmatprep.mubr.f32.mxu1 %v229_v45 }
  0x48   : > { %719 = vmatmul.mubr.f32.gmra.mrb[10].mxu0 %v214_v46  ;;  %743 = vmatmul.mubr.f32.gmra.mrb[10].mxu1 %v230_v47 }
  0x49   : > { %721 = vmatprep.mubr.f32.mxu0 %v215_v48  ;;  %745 = vmatprep.mubr.f32.mxu1 %v231_v49 }
  0x4c   : > { %722 = vmatmul.mubr.f32.gmra.mrb[12].mxu0 %v216_v50  ;;  %746 = vmatmul.mubr.f32.gmra.mrb[12].mxu1 %v232_v51 }
  0x4d   : > { %724 = vmatprep.mubr.f32.mxu0 %v217_v52  ;;  %748 = vmatprep.mubr.f32.mxu1 %v233_v53 }
  0x50   : > { %725 = vmatmul.mubr.f32.gmra.mrb[14].mxu0 %v218_v54  ;;  %749 = vmatmul.mubr.f32.gmra.mrb[14].mxu1 %v234_v55 }
 0x107   : > { %v705_v56 = vpop.f32.mrb[0].mxu0  ;;  %v729_v57 = vpop.f32.mrb[0].mxu1 }
 0x108   : > { %477 = vst [vmem:[%s949_s23 + $0x8] sm:$0xff] %v705_v56  ;;  %493 = vst [vmem:[%s949_s23 + $0x88] sm:$0xff] %v729_v57  ;;  %v317_v58 = vpop.f32.mrb[1].mxu0  ;;  %v397_v59 = vpop.f32.mrb[1].mxu1 }
 0x109   : > { %476 = vst [vmem:[%s949_s23] sm:$0xff] %v317_v58  ;;  %492 = vst [vmem:[%s949_s23 + $0x80] sm:$0xff] %v397_v59 }
 0x10b   : > { %v708_v60 = vpop.f32.mrb[2].mxu0  ;;  %v732_v61 = vpop.f32.mrb[2].mxu1 }
 0x10c   : > { %479 = vst [vmem:[%s949_s23 + $0x18] sm:$0xff] %v708_v60  ;;  %495 = vst [vmem:[%s949_s23 + $0x98] sm:$0xff] %v732_v61  ;;  %v327_v62 = vpop.f32.mrb[3].mxu0  ;;  %v407_v63 = vpop.f32.mrb[3].mxu1 }
 0x10d   : > { %478 = vst [vmem:[%s949_s23 + $0x10] sm:$0xff] %v327_v62  ;;  %494 = vst [vmem:[%s949_s23 + $0x90] sm:$0xff] %v407_v63 }
 0x10f   : > { %v711_v0 = vpop.f32.mrb[4].mxu0  ;;  %v735_v1 = vpop.f32.mrb[4].mxu1 }
 0x110   : > { %481 = vst [vmem:[%s949_s23 + $0x28] sm:$0xff] %v711_v0  ;;  %497 = vst [vmem:[%s949_s23 + $0xa8] sm:$0xff] %v735_v1  ;;  %v337_v2 = vpop.f32.mrb[5].mxu0  ;;  %v417_v3 = vpop.f32.mrb[5].mxu1 }
 0x111   : > { %480 = vst [vmem:[%s949_s23 + $0x20] sm:$0xff] %v337_v2  ;;  %496 = vst [vmem:[%s949_s23 + $0xa0] sm:$0xff] %v417_v3 }
 0x113   : > { %v714_v4 = vpop.f32.mrb[6].mxu0  ;;  %v738_v5 = vpop.f32.mrb[6].mxu1 }
 0x114   : > { %483 = vst [vmem:[%s949_s23 + $0x38] sm:$0xff] %v714_v4  ;;  %499 = vst [vmem:[%s949_s23 + $0xb8] sm:$0xff] %v738_v5  ;;  %v347_v6 = vpop.f32.mrb[7].mxu0  ;;  %v427_v7 = vpop.f32.mrb[7].mxu1 }
 0x115   : > { %482 = vst [vmem:[%s949_s23 + $0x30] sm:$0xff] %v347_v6  ;;  %498 = vst [vmem:[%s949_s23 + $0xb0] sm:$0xff] %v427_v7 }
 0x117   : > { %v717_v8 = vpop.f32.mrb[8].mxu0  ;;  %v741_v9 = vpop.f32.mrb[8].mxu1 }
 0x118   : > { %485 = vst [vmem:[%s949_s23 + $0x48] sm:$0xff] %v717_v8  ;;  %501 = vst [vmem:[%s949_s23 + $0xc8] sm:$0xff] %v741_v9  ;;  %v357_v10 = vpop.f32.mrb[9].mxu0  ;;  %v437_v11 = vpop.f32.mrb[9].mxu1 }
 0x119   : > { %484 = vst [vmem:[%s949_s23 + $0x40] sm:$0xff] %v357_v10  ;;  %500 = vst [vmem:[%s949_s23 + $0xc0] sm:$0xff] %v437_v11 }
 0x11b   : > { %v720_v12 = vpop.f32.mrb[10].mxu0  ;;  %v744_v13 = vpop.f32.mrb[10].mxu1 }
 0x11c   : > { %487 = vst [vmem:[%s949_s23 + $0x58] sm:$0xff] %v720_v12  ;;  %503 = vst [vmem:[%s949_s23 + $0xd8] sm:$0xff] %v744_v13  ;;  %v367_v14 = vpop.f32.mrb[11].mxu0  ;;  %v447_v15 = vpop.f32.mrb[11].mxu1 }
 0x11d   : > { %486 = vst [vmem:[%s949_s23 + $0x50] sm:$0xff] %v367_v14  ;;  %502 = vst [vmem:[%s949_s23 + $0xd0] sm:$0xff] %v447_v15 }
 0x11f   : > { %v723_v16 = vpop.f32.mrb[12].mxu0  ;;  %v747_v17 = vpop.f32.mrb[12].mxu1 }
 0x120   : > { %489 = vst [vmem:[%s949_s23 + $0x68] sm:$0xff] %v723_v16  ;;  %505 = vst [vmem:[%s949_s23 + $0xe8] sm:$0xff] %v747_v17  ;;  %v377_v18 = vpop.f32.mrb[13].mxu0  ;;  %v457_v19 = vpop.f32.mrb[13].mxu1 }
 0x121   : > { %488 = vst [vmem:[%s949_s23 + $0x60] sm:$0xff] %v377_v18  ;;  %504 = vst [vmem:[%s949_s23 + $0xe0] sm:$0xff] %v457_v19 }
 0x123   : > { %v726_v20 = vpop.f32.mrb[14].mxu0  ;;  %v750_v21 = vpop.f32.mrb[14].mxu1 }
 0x124   : > { %491 = vst [vmem:[%s949_s23 + $0x78] sm:$0xff] %v726_v20  ;;  %507 = vst [vmem:[%s949_s23 + $0xf8] sm:$0xff] %v750_v21  ;;  %v387_v22 = vpop.f32.mrb[15].mxu0  ;;  %v467_v23 = vpop.f32.mrb[15].mxu1 }
 0x125   : > { %490 = vst [vmem:[%s949_s23 + $0x70] sm:$0xff] %v387_v22  ;;  %506 = vst [vmem:[%s949_s23 + $0xf0] sm:$0xff] %v467_v23 }
 0x126 PF: > { %s12_s11 = sadd.s32 1, %s845_s11   ;;  %s995_s9 = smov %s841_s10 }
 0x127   : > { %p9_p5 = scmp.ge.s32.totalorder %s12_s11, 4   ;;  %s996_s10 = smov %s998_s12 }
 0x129   :  { %11 = sbr.rel (!%p9_p5) target bundleno = 2 (0x2), region = 61 }

</bundles_post_ra>
